<compile_context>
chip_gen: v5e
topology: v5e:2x2
jax: 0.10.0
libtpu: 0.0.40
codegen_flags: <defaults>
</compile_context>

<pallas_src>
import functools

import jax
import jax.numpy as jnp
from jax.experimental import pallas as pl
from jax.experimental.pallas import tpu as pltpu

LN_EPS = 1e-5


def convgru_kernel(h_ref, x_ref, wx_ref, whzr_ref, wqh_ref,
                   gamma_ref, beta_ref, out_ref):
    # h_ref / x_ref / out_ref: (1, C, TILE_P) -- channels on sublanes,
    # pixels on lanes.  wx: (3C, C), whzr: (2C, C), wqh: (C, C),
    # gamma/beta: (C, 1).
    h = h_ref[0].astype(jnp.float32)              # (C, TP)
    x = x_ref[0].astype(jnp.float32)              # (C, TP)
    C = h.shape[0]

    w_x = wx_ref[...].astype(jnp.float32)         # (3C, C)
    w_hzr = whzr_ref[...].astype(jnp.float32)     # (2C, C)
    w_qh = wqh_ref[...].astype(jnp.float32)       # (C, C)

    # x-side contributions for z, r, q in one MXU pass (no activation concat).
    gx = jnp.dot(w_x, x, preferred_element_type=jnp.float32)      # (3C, TP)
    # h-side contributions for z, r.
    gh = jnp.dot(w_hzr, h, preferred_element_type=jnp.float32)    # (2C, TP)

    z = jax.nn.sigmoid(gx[:C] + gh[:C])           # (C, TP)
    r = jax.nn.sigmoid(gx[C:2 * C] + gh[C:])      # (C, TP)

    # Candidate state q.
    q = gx[2 * C:] + jnp.dot(w_qh, r * h, preferred_element_type=jnp.float32)

    out = (1.0 - z) * h + z * q                   # (C, TP)

    # LayerNorm over the channel (sublane) axis; biased variance (PyTorch LN).
    mean = jnp.mean(out, axis=0, keepdims=True)
    centered = out - mean
    var = jnp.mean(centered * centered, axis=0, keepdims=True)
    normed = centered * jax.lax.rsqrt(var + LN_EPS)

    gamma = gamma_ref[...].astype(jnp.float32)    # (C, 1) -> broadcast on lanes
    beta = beta_ref[...].astype(jnp.float32)
    out_ref[0] = (normed * gamma + beta).astype(out_ref.dtype)


@functools.partial(jax.jit, static_argnames=("tile_p",))
def _conv_gru_4d(h, x, params, *, tile_p):
    B, C, H, W = h.shape
    P = H * W
    wz, wr, wq, gamma, beta = params

    # Repack the PyTorch-shaped 1x1-conv weights (tiny, one-time XLA ops):
    #   Wz, Wr, Wq : (C, 2C) with input columns ordered [h | x].
    w_x = jnp.concatenate([wz[:, C:], wr[:, C:], wq[:, C:]], axis=0)   # (3C, C)
    w_hzr = jnp.concatenate([wz[:, :C], wr[:, :C]], axis=0)            # (2C, C)
    w_qh = wq[:, :C]                                                   # ( C, C)
    gamma2 = gamma.reshape(C, 1)
    beta2 = beta.reshape(C, 1)

    # Pure reshape (no transpose): NCHW is already (B, C, H*W)-contiguous.
    h3 = h.reshape(B, C, P)
    x3 = x.reshape(B, C, P)

    # Pixel tile: as large as practical (amortizes the ~0.35us per-step
    # overhead); last block dim must be a multiple of 128 or the full extent.
    if P <= tile_p or P % 128 != 0:
        tp = P
    else:
        tp = (min(tile_p, P) // 128) * 128

    grid = (B, pl.cdiv(P, tp))

    act_spec = pl.BlockSpec((1, C, tp), lambda b, p: (b, 0, p))
    wx_spec = pl.BlockSpec((3 * C, C), lambda b, p: (0, 0))
    whzr_spec = pl.BlockSpec((2 * C, C), lambda b, p: (0, 0))
    wqh_spec = pl.BlockSpec((C, C), lambda b, p: (0, 0))
    vec_spec = pl.BlockSpec((C, 1), lambda b, p: (0, 0))

    act_item = jnp.dtype(h.dtype).itemsize
    w_item = jnp.dtype(wz.dtype).itemsize
    cost = pl.CostEstimate(
        flops=2 * B * P * 6 * C * C,
        transcendentals=B * P * (2 * C + 1),
        bytes_accessed=3 * B * P * C * act_item
        + (wz.size + wr.size + wq.size + gamma.size + beta.size) * w_item,
    )

    out3 = pl.pallas_call(
        convgru_kernel,
        out_shape=jax.ShapeDtypeStruct((B, C, P), h.dtype),
        grid_spec=pltpu.PrefetchScalarGridSpec(
            num_scalar_prefetch=0,
            grid=grid,
            in_specs=[act_spec, act_spec, wx_spec, whzr_spec, wqh_spec,
                      vec_spec, vec_spec],
            out_specs=act_spec,
        ),
        compiler_params=pltpu.CompilerParams(
            dimension_semantics=("parallel", "parallel")),
        cost_estimate=cost,
    )(h3, x3, w_x, w_hzr, w_qh, gamma2, beta2)

    return out3.reshape(B, C, H, W)


def conv_gru(h, x, params, *, tile_p=8192):
    """ConvGRU forward.  h, x: (B, C, H, W) or (C, H, W).  Returns NCHW."""
    if h.ndim == 3:
        h = h[None]
    if x.ndim == 3:
        x = x[None]
    return _conv_gru_4d(h, x, params, tile_p=tile_p)


def make_params(key, out_channels, dtype=jnp.float32):
    """Synthetic parameters matching the PyTorch module layout.

    convz/convr/convq: Conv2d(2C -> C, k=1, bias=False) -> weight (C, 2C)
    after dropping the 1x1 spatial dims (input cols ordered [h | x]).
    LayerNorm(C): gamma, beta of shape (C,).
    """
    C = out_channels
    kz, kr, kq, kg, kb = jax.random.split(key, 5)
    wz = (jax.random.normal(kz, (C, 2 * C), dtype=jnp.float32) * 0.1).astype(dtype)
    wr = (jax.random.normal(kr, (C, 2 * C), dtype=jnp.float32) * 0.1).astype(dtype)
    wq = (jax.random.normal(kq, (C, 2 * C), dtype=jnp.float32) * 0.1).astype(dtype)
    gamma = (1.0 + 0.05 * jax.random.normal(kg, (C,))).astype(dtype)
    beta = (0.05 * jax.random.normal(kb, (C,))).astype(dtype)
    return (wz, wr, wq, gamma, beta)


def conv_gru_reference(h, x, params):
    """Pure-JAX channels-last reference for correctness checking."""
    B, C, H, W = h.shape
    wz, wr, wq, gamma, beta = params
    wz = wz.astype(jnp.float32)
    wr = wr.astype(jnp.float32)
    wq = wq.astype(jnp.float32)
    hf = jnp.transpose(h, (0, 2, 3, 1)).reshape(-1, C).astype(jnp.float32)
    xf = jnp.transpose(x, (0, 2, 3, 1)).reshape(-1, C).astype(jnp.float32)
    hx = jnp.concatenate([hf, xf], axis=-1)                 # (N, 2C)
    z = jax.nn.sigmoid(hx @ wz.T)                           # (N, C)
    r = jax.nn.sigmoid(hx @ wr.T)                           # (N, C)
    q = jnp.concatenate([r * hf, xf], axis=-1) @ wq.T       # (N, C)
    out = (1.0 - z) * hf + z * q
    mean = out.mean(-1, keepdims=True)
    var = ((out - mean) ** 2).mean(-1, keepdims=True)
    out = (out - mean) / jnp.sqrt(var + LN_EPS)
    out = (out * gamma.reshape(1, C).astype(jnp.float32)
           + beta.reshape(1, C).astype(jnp.float32))
    return jnp.transpose(out.reshape(B, H, W, C), (0, 3, 1, 2)).astype(h.dtype)


if __name__ == "__main__":
    B, C, H, W = 2, 32, 16, 16   # out_channels = 32
    key = jax.random.PRNGKey(0)
    kh, kx, kp = jax.random.split(key, 3)

    h = jax.random.normal(kh, (B, C, H, W), dtype=jnp.float32)
    x = jax.random.normal(kx, (B, C, H, W), dtype=jnp.float32)
    params = make_params(kp, C)

    out = conv_gru(h, x, params)
    out = jax.block_until_ready(out)

    ref = conv_gru_reference(h, x, params)
    assert out.shape == (B, C, H, W), out.shape
    assert jnp.allclose(out, ref, atol=1e-4, rtol=1e-4), \
        float(jnp.max(jnp.abs(out - ref)))

    print("KERNEL_OK")
</pallas_src>

<mosaic_0001>
module attributes {stable_mosaic.version = 11 : i64} {
  func.func @convgru_kernel(%arg0: i32, %arg1: i32, %arg2: memref<1x32x256xf32, #tpu.memory_space<vmem>>, %arg3: memref<1x32x256xf32, #tpu.memory_space<vmem>>, %arg4: memref<96x32xf32, #tpu.memory_space<vmem>>, %arg5: memref<64x32xf32, #tpu.memory_space<vmem>>, %arg6: memref<32x32xf32, #tpu.memory_space<vmem>>, %arg7: memref<32x1xf32, #tpu.memory_space<vmem>>, %arg8: memref<32x1xf32, #tpu.memory_space<vmem>>, %arg9: memref<1x32x256xf32, #tpu.memory_space<vmem>>) attributes {dimension_semantics = [#tpu.dimension_semantics<parallel>, #tpu.dimension_semantics<parallel>], iteration_bounds = array<i64: 2, 1>, scalar_prefetch = 0 : i64, scratch_operands = 0 : i64, tpu.core_type = #tpu.core_type<tc>, window_params = [{transform_indices = @transform_0, window_bounds = array<i64: 1, 32, 256>}, {transform_indices = @transform_1, window_bounds = array<i64: 1, 32, 256>}, {pipeline_mode = #tpu.pipeline_mode<synchronous>, transform_indices = @transform_2, window_bounds = array<i64: 96, 32>}, {pipeline_mode = #tpu.pipeline_mode<synchronous>, transform_indices = @transform_3, window_bounds = array<i64: 64, 32>}, {pipeline_mode = #tpu.pipeline_mode<synchronous>, transform_indices = @transform_4, window_bounds = array<i64: 32, 32>}, {pipeline_mode = #tpu.pipeline_mode<synchronous>, transform_indices = @transform_5, window_bounds = array<i64: 32, 1>}, {pipeline_mode = #tpu.pipeline_mode<synchronous>, transform_indices = @transform_6, window_bounds = array<i64: 32, 1>}, {transform_indices = @transform_7, window_bounds = array<i64: 1, 32, 256>}]} {
    %c0 = arith.constant 0 : index
    %c0_0 = arith.constant 0 : index
    %c0_1 = arith.constant 0 : index
    %0 = vector.load %arg2[%c0, %c0_0, %c0_1] : memref<1x32x256xf32, #tpu.memory_space<vmem>>, vector<1x32x256xf32>
    %1 = vector.shape_cast %0 : vector<1x32x256xf32> to vector<32x256xf32>
    %c0_2 = arith.constant 0 : index
    %c0_3 = arith.constant 0 : index
    %c0_4 = arith.constant 0 : index
    %2 = vector.load %arg3[%c0_2, %c0_3, %c0_4] : memref<1x32x256xf32, #tpu.memory_space<vmem>>, vector<1x32x256xf32>
    %3 = vector.shape_cast %2 : vector<1x32x256xf32> to vector<32x256xf32>
    %c0_5 = arith.constant 0 : index
    %c0_6 = arith.constant 0 : index
    %4 = vector.load %arg4[%c0_5, %c0_6] : memref<96x32xf32, #tpu.memory_space<vmem>>, vector<96x32xf32>
    %c0_7 = arith.constant 0 : index
    %c0_8 = arith.constant 0 : index
    %5 = vector.load %arg5[%c0_7, %c0_8] : memref<64x32xf32, #tpu.memory_space<vmem>>, vector<64x32xf32>
    %c0_9 = arith.constant 0 : index
    %c0_10 = arith.constant 0 : index
    %6 = vector.load %arg6[%c0_9, %c0_10] : memref<32x32xf32, #tpu.memory_space<vmem>>, vector<32x32xf32>
    %cst = arith.constant dense<0.000000e+00> : vector<96x256xf32>
    %7 = tpu.matmul %4, %3, %cst {dimension_numbers = #tpu.dot_dimension_numbers<[1], [0], [0], [1], [0, 0, 1, 1], [], []>} : vector<96x32xf32>, vector<32x256xf32>, vector<96x256xf32> -> vector<96x256xf32>
    %cst_11 = arith.constant dense<0.000000e+00> : vector<64x256xf32>
    %8 = tpu.matmul %5, %1, %cst_11 {dimension_numbers = #tpu.dot_dimension_numbers<[1], [0], [0], [1], [0, 0, 1, 1], [], []>} : vector<64x32xf32>, vector<32x256xf32>, vector<64x256xf32> -> vector<64x256xf32>
    %9 = vector.extract_strided_slice %7 {offsets = [0, 0], sizes = [32, 256], strides = [1, 1]} : vector<96x256xf32> to vector<32x256xf32>
    %10 = vector.extract_strided_slice %8 {offsets = [0, 0], sizes = [32, 256], strides = [1, 1]} : vector<64x256xf32> to vector<32x256xf32>
    %11 = arith.addf %9, %10 : vector<32x256xf32>
    %12 = arith.negf %11 : vector<32x256xf32>
    %13 = math.exp %12 : vector<32x256xf32>
    %cst_12 = arith.constant 1.000000e+00 : f32
    %14 = vector.broadcast %cst_12 : f32 to vector<32x256xf32>
    %15 = arith.addf %14, %13 : vector<32x256xf32>
    %16 = arith.divf %14, %15 : vector<32x256xf32>
    %17 = vector.extract_strided_slice %7 {offsets = [32, 0], sizes = [32, 256], strides = [1, 1]} : vector<96x256xf32> to vector<32x256xf32>
    %18 = vector.extract_strided_slice %8 {offsets = [32, 0], sizes = [32, 256], strides = [1, 1]} : vector<64x256xf32> to vector<32x256xf32>
    %19 = arith.addf %17, %18 : vector<32x256xf32>
    %20 = arith.negf %19 : vector<32x256xf32>
    %21 = math.exp %20 : vector<32x256xf32>
    %cst_13 = arith.constant 1.000000e+00 : f32
    %22 = vector.broadcast %cst_13 : f32 to vector<32x256xf32>
    %23 = arith.addf %22, %21 : vector<32x256xf32>
    %24 = arith.divf %22, %23 : vector<32x256xf32>
    %25 = vector.extract_strided_slice %7 {offsets = [64, 0], sizes = [32, 256], strides = [1, 1]} : vector<96x256xf32> to vector<32x256xf32>
    %26 = arith.mulf %24, %1 : vector<32x256xf32>
    %cst_14 = arith.constant dense<0.000000e+00> : vector<32x256xf32>
    %27 = tpu.matmul %6, %26, %cst_14 {dimension_numbers = #tpu.dot_dimension_numbers<[1], [0], [0], [1], [0, 0, 1, 1], [], []>} : vector<32x32xf32>, vector<32x256xf32>, vector<32x256xf32> -> vector<32x256xf32>
    %28 = arith.addf %25, %27 : vector<32x256xf32>
    %cst_15 = arith.constant 1.000000e+00 : f32
    %29 = vector.broadcast %cst_15 : f32 to vector<32x256xf32>
    %30 = arith.subf %29, %16 : vector<32x256xf32>
    %31 = arith.mulf %30, %1 : vector<32x256xf32>
    %32 = arith.mulf %16, %28 : vector<32x256xf32>
    %33 = arith.addf %31, %32 : vector<32x256xf32>
    %cst_16 = arith.constant dense<0.000000e+00> : vector<256xf32>
    %34 = vector.multi_reduction <add>, %33, %cst_16 [0] : vector<32x256xf32> to vector<256xf32>
    %35 = vector.shape_cast %34 : vector<256xf32> to vector<1x256xf32>
    %cst_17 = arith.constant 3.200000e+01 : f32
    %36 = vector.broadcast %cst_17 : f32 to vector<1x256xf32>
    %37 = arith.divf %35, %36 : vector<1x256xf32>
    %38 = vector.broadcast %37 : vector<1x256xf32> to vector<32x256xf32>
    %39 = arith.subf %33, %38 : vector<32x256xf32>
    %40 = arith.mulf %39, %39 : vector<32x256xf32>
    %cst_18 = arith.constant dense<0.000000e+00> : vector<256xf32>
    %41 = vector.multi_reduction <add>, %40, %cst_18 [0] : vector<32x256xf32> to vector<256xf32>
    %42 = vector.shape_cast %41 : vector<256xf32> to vector<1x256xf32>
    %cst_19 = arith.constant 3.200000e+01 : f32
    %43 = vector.broadcast %cst_19 : f32 to vector<1x256xf32>
    %44 = arith.divf %42, %43 : vector<1x256xf32>
    %cst_20 = arith.constant 9.99999974E-6 : f32
    %45 = vector.broadcast %cst_20 : f32 to vector<1x256xf32>
    %46 = arith.addf %44, %45 : vector<1x256xf32>
    %47 = math.rsqrt %46 : vector<1x256xf32>
    %48 = vector.broadcast %47 : vector<1x256xf32> to vector<32x256xf32>
    %49 = arith.mulf %39, %48 : vector<32x256xf32>
    %c0_21 = arith.constant 0 : index
    %c0_22 = arith.constant 0 : index
    %50 = vector.load %arg7[%c0_21, %c0_22] : memref<32x1xf32, #tpu.memory_space<vmem>>, vector<32x1xf32>
    %c0_23 = arith.constant 0 : index
    %c0_24 = arith.constant 0 : index
    %51 = vector.load %arg8[%c0_23, %c0_24] : memref<32x1xf32, #tpu.memory_space<vmem>>, vector<32x1xf32>
    %52 = vector.broadcast %50 : vector<32x1xf32> to vector<32x256xf32>
    %53 = arith.mulf %49, %52 : vector<32x256xf32>
    %54 = vector.broadcast %51 : vector<32x1xf32> to vector<32x256xf32>
    %55 = arith.addf %53, %54 : vector<32x256xf32>
    %c0_25 = arith.constant 0 : index
    %c0_26 = arith.constant 0 : index
    %c0_27 = arith.constant 0 : index
    %56 = vector.load %arg9[%c0_25, %c0_26, %c0_27] : memref<1x32x256xf32, #tpu.memory_space<vmem>>, vector<1x32x256xf32>
    %57 = vector.shape_cast %56 : vector<1x32x256xf32> to vector<32x256xf32>
    %58 = vector.shape_cast %55 : vector<32x256xf32> to vector<1x32x256xf32>
    tpu.vector_store %arg9[%c0_25, %c0_26, %c0_27], %58 {strides = array<i32>} : memref<1x32x256xf32, #tpu.memory_space<vmem>>, vector<1x32x256xf32>,
    return
  }
  func.func @transform_0(%arg0: i32, %arg1: i32) -> (i32, i32, i32) {
    %c0_i32 = arith.constant 0 : i32
    %c0_i32_0 = arith.constant 0 : i32
    return %arg0, %c0_i32, %arg1 : i32, i32, i32
  }
  func.func @transform_1(%arg0: i32, %arg1: i32) -> (i32, i32, i32) {
    %c0_i32 = arith.constant 0 : i32
    %c0_i32_0 = arith.constant 0 : i32
    return %arg0, %c0_i32, %arg1 : i32, i32, i32
  }
  func.func @transform_2(%arg0: i32, %arg1: i32) -> (i32, i32) {
    %c0_i32 = arith.constant 0 : i32
    %c0_i32_0 = arith.constant 0 : i32
    %c0_i32_1 = arith.constant 0 : i32
    return %c0_i32, %c0_i32_0 : i32, i32
  }
  func.func @transform_3(%arg0: i32, %arg1: i32) -> (i32, i32) {
    %c0_i32 = arith.constant 0 : i32
    %c0_i32_0 = arith.constant 0 : i32
    %c0_i32_1 = arith.constant 0 : i32
    return %c0_i32, %c0_i32_0 : i32, i32
  }
  func.func @transform_4(%arg0: i32, %arg1: i32) -> (i32, i32) {
    %c0_i32 = arith.constant 0 : i32
    %c0_i32_0 = arith.constant 0 : i32
    %c0_i32_1 = arith.constant 0 : i32
    return %c0_i32, %c0_i32_0 : i32, i32
  }
  func.func @transform_5(%arg0: i32, %arg1: i32) -> (i32, i32) {
    %c0_i32 = arith.constant 0 : i32
    %c0_i32_0 = arith.constant 0 : i32
    %c0_i32_1 = arith.constant 0 : i32
    return %c0_i32, %c0_i32_0 : i32, i32
  }
  func.func @transform_6(%arg0: i32, %arg1: i32) -> (i32, i32) {
    %c0_i32 = arith.constant 0 : i32
    %c0_i32_0 = arith.constant 0 : i32
    %c0_i32_1 = arith.constant 0 : i32
    return %c0_i32, %c0_i32_0 : i32, i32
  }
  func.func @transform_7(%arg0: i32, %arg1: i32) -> (i32, i32, i32) {
    %c0_i32 = arith.constant 0 : i32
    %c0_i32_0 = arith.constant 0 : i32
    return %arg0, %c0_i32, %arg1 : i32, i32, i32
  }
}

</mosaic_0001>

<bundles_post_ra>
// kernel: _conv_gru_4d.1
= control target key start
LH: loop header
LB: loop body
LE: loop exit
PB: predicated region body
PF: predicated region fallthrough
CT: control target
= control target key end

     0   :  { %s1600_s24 = smov 0   ;;  %s1602_s25 = smov 0   ;;  %s2291_s0 = inlined_call_operand.vmem [shape: f32[2,32,256], index: 0, kind: input, shape index: {}]   ;;  %s2292_s1 = inlined_call_operand.vmem [shape: f32[2,32,256], index: 1, kind: input, shape index: {}]   ;;  %s2293_s2 = inlined_call_operand.vmem [shape: f32[96,32], index: 2, kind: input, shape index: {}]   ;;  %s2294_s3 = inlined_call_operand.vmem [shape: f32[64,32], index: 3, kind: input, shape index: {}]   ;;  %s2295_s4 = inlined_call_operand.vmem [shape: f32[32,32], index: 4, kind: input, shape index: {}]   ;;  %s2296_s5 = inlined_call_operand.vmem [shape: f32[32,1], index: 5, kind: input, shape index: {}]   ;;  %s2297_s6 = inlined_call_operand.vmem [shape: f32[32,1], index: 6, kind: input, shape index: {}]   ;;  %s2298_s7 = inlined_call_operand.vmem [shape: f32[2,32,256], index: 7, kind: output, shape index: {}]  }
   0x1   :  { %s1604_s26 = smov 0  }
   0x2 LB: > { %s29_s27 = sadd.s32 1, %s1552_s25  ;;  %p1355_p0 = scmp.ge.s32.totalorder %s1556_s26, 1  ;;  %s1556_s26 = sphi %s1604_s26, %s17_s26   ;;  %s1552_s25 = sphi %s1602_s25, %s2337_s25   ;;  %s1548_s24 = sphi %s1600_s24, %s2336_s24  }
   0x3   : > { %p31_p1 = scmp.ge.s32.totalorder %s29_s27, 2  ;;  %p275_p2 = scmp.lt.s32.totalorder %s1556_s26, 3 }
   0x5   : > { %s2339_s27 = smov (%p31_p1, %s29_s27), 0  ;;  %p276_p3 = pnand %p1355_p0, %p275_p2 }
   0x6   : > { %p325_p4 = scmp.lt.s32.totalorder (!%p276_p3), %s1548_s24, 1 }
   0x7   : > { %279 = sbr.rel (%p276_p3) target bundleno = 487 (0x1e7), region = 48 }
   0xc   : > { %s2341_s24 = smov (!%p325_p4, %s1548_s24), 1  ;;  %v382_v12 = vld [vmem:[%s2294_s3] sm:$0xff]  ;;  %vm394_vm0 = vcmask 261120   ;;  %v383_v18 = vld [vmem:[%s2294_s3 + $0x8] sm:$0xff]  ;;  %v384_v20 = vld [vmem:[%s2294_s3 + $0x10] sm:$0xff] }
   0xd   : > { %s1618_s28 = sshll.u32 %s2341_s24, 6  ;;  %v370_v17 = vld [vmem:[%s2293_s2] sm:$0xff]  ;;  %v371_v19 = vld [vmem:[%s2293_s2 + $0x8] sm:$0xff]  ;;  %v372_v21 = vld [vmem:[%s2293_s2 + $0x10] sm:$0xff] }
   0xe   : > { %s1624_s8 = scalar_lea.vmem %s2291_s0, %s1618_s28  ;;  %s1630_s11 = scalar_lea.vmem %s2292_s1, %s1618_s28  ;;  %v385_v22 = vld [vmem:[%s2294_s3 + $0x18] sm:$0xff]  ;;  %v386_v24 = vld [vmem:[%s2294_s3 + $0x20] sm:$0xff]  ;;  %v387_v26 = vld [vmem:[%s2294_s3 + $0x28] sm:$0xff] }
   0xf   : > { %v1633_v0 = vld [vmem:[%s1624_s8 + $0x30] sm:$0xff]  ;;  %v1636_v1 = vld [vmem:[%s1624_s8 + $0x38] sm:$0xff]  ;;  %v1639_v2 = vld [vmem:[%s1624_s8 + $0x20] sm:$0xff]  ;;  %s352_s23 = scalar_lea.vmem %s2298_s7, %s1618_s28 }
  0x10   : > { %573 = vmatpush.msra.mxu2 %v1633_v0  ;;  %614 = vmatpush.msra.mxu3 %v1636_v1  ;;  %v1644_v3 = vld [vmem:[%s1624_s8 + $0x28] sm:$0xff]  ;;  %v1647_v4 = vld [vmem:[%s1624_s8 + $0x10] sm:$0xff]  ;;  %v1650_v5 = vld [vmem:[%s1624_s8 + $0x18] sm:$0xff] }
  0x11   : > { %v368_v6 = vld [vmem:[%s1630_s11 + $0x30] sm:$0xff]  ;;  %v369_v7 = vld [vmem:[%s1630_s11 + $0x38] sm:$0xff]  ;;  %v366_v8 = vld [vmem:[%s1630_s11 + $0x20] sm:$0xff] }
  0x12   : > { %574 = vmatpush.msra.mxu2 %v1639_v2  ;;  %615 = vmatpush.msra.mxu3 %v1644_v3  ;;  %v367_v9 = vld [vmem:[%s1630_s11 + $0x28] sm:$0xff]  ;;  %v1659_v10 = vld [vmem:[%s1624_s8] sm:$0xff]  ;;  %v364_v13 = vld [vmem:[%s1630_s11 + $0x10] sm:$0xff] }
  0x13   : > { %443 = vmatpush.msra.mxu0 %v368_v6  ;;  %496 = vmatpush.msra.mxu1 %v369_v7  ;;  %v1662_v11 = vld [vmem:[%s1624_s8 + $0x8] sm:$0xff]  ;;  %v365_v14 = vld [vmem:[%s1630_s11 + $0x18] sm:$0xff]  ;;  %v362_v15 = vld [vmem:[%s1630_s11] sm:$0xff] }
  0x14   : > { %575 = vmatpush.msra.mxu2 %v1647_v4  ;;  %616 = vmatpush.msra.mxu3 %v1650_v5  ;;  %v363_v16 = vld [vmem:[%s1630_s11 + $0x8] sm:$0xff]  ;;  %v373_v23 = vld [vmem:[%s2293_s2 + $0x18] sm:$0xff]  ;;  %v374_v25 = vld [vmem:[%s2293_s2 + $0x20] sm:$0xff] }
  0x15   : > { %444 = vmatpush.msra.mxu0 %v366_v8  ;;  %497 = vmatpush.msra.mxu1 %v367_v9  ;;  %v375_v27 = vld [vmem:[%s2293_s2 + $0x28] sm:$0xff]  ;;  %v388_v28 = vld [vmem:[%s2294_s3 + $0x30] sm:$0xff]  ;;  %v389_v30 = vld [vmem:[%s2294_s3 + $0x38] sm:$0xff] }
  0x16   : > { %576 = vmatpush.msra.mxu2 %v1659_v10  ;;  %617 = vmatpush.msra.mxu3 %v1662_v11  ;;  %v376_v29 = vld [vmem:[%s2293_s2 + $0x30] sm:$0xff]  ;;  %v377_v31 = vld [vmem:[%s2293_s2 + $0x38] sm:$0xff] }
  0x17   : > { %1386 = vmatmul.msk.f32.vlgmr.msra.gmra.mxu2 %vm394_vm0, %v382_v12  ;;  %1394 = vmatmul.msk.f32.vlgmr.msra.gmra.mxu3 %vm394_vm0, %v382_v12 }
  0x18   : > { %445 = vmatpush.msra.mxu0 %v364_v13  ;;  %498 = vmatpush.msra.mxu1 %v365_v14 }
  0x1a   : > { %446 = vmatpush.msra.mxu0 %v362_v15  ;;  %499 = vmatpush.msra.mxu1 %v363_v16 }
  0x1b   : > { %1362 = vmatmul.msk.f32.vlgmr.msra.gmra.mxu0 %vm394_vm0, %v370_v17  ;;  %1374 = vmatmul.msk.f32.vlgmr.msra.gmra.mxu1 %vm394_vm0, %v370_v17 }
  0x1f   : > { %1387 = vmatmul.msk.f32.gmra.mxu2 %vm394_vm0, %v383_v18  ;;  %1395 = vmatmul.msk.f32.gmra.mxu3 %vm394_vm0, %v383_v18 }
  0x23   : > { %1363 = vmatmul.msk.f32.gmra.mxu0 %vm394_vm0, %v371_v19  ;;  %1375 = vmatmul.msk.f32.gmra.mxu1 %vm394_vm0, %v371_v19 }
  0x27   : > { %1388 = vmatmul.msk.f32.gmra.mxu2 %vm394_vm0, %v384_v20  ;;  %1396 = vmatmul.msk.f32.gmra.mxu3 %vm394_vm0, %v384_v20 }
  0x2b   : > { %1364 = vmatmul.msk.f32.gmra.mxu0 %vm394_vm0, %v372_v21  ;;  %1376 = vmatmul.msk.f32.gmra.mxu1 %vm394_vm0, %v372_v21 }
  0x2f   : > { %1389 = vmatmul.msk.f32.gmra.mxu2 %vm394_vm0, %v385_v22  ;;  %1397 = vmatmul.msk.f32.gmra.mxu3 %vm394_vm0, %v385_v22 }
  0x33   : > { %1365 = vmatmul.msk.f32.gmra.mxu0 %vm394_vm0, %v373_v23  ;;  %1377 = vmatmul.msk.f32.gmra.mxu1 %vm394_vm0, %v373_v23 }
  0x37   : > { %1390 = vmatmul.msk.f32.gmra.mxu2 %vm394_vm0, %v386_v24  ;;  %1398 = vmatmul.msk.f32.gmra.mxu3 %vm394_vm0, %v386_v24 }
  0x3b   : > { %1366 = vmatmul.msk.f32.gmra.mxu0 %vm394_vm0, %v374_v25  ;;  %1378 = vmatmul.msk.f32.gmra.mxu1 %vm394_vm0, %v374_v25 }
  0x3f   : > { %1391 = vmatmul.msk.f32.gmra.mxu2 %vm394_vm0, %v387_v26  ;;  %1399 = vmatmul.msk.f32.gmra.mxu3 %vm394_vm0, %v387_v26 }
  0x43   : > { %1367 = vmatmul.msk.f32.gmra.mxu0 %vm394_vm0, %v375_v27  ;;  %1379 = vmatmul.msk.f32.gmra.mxu1 %vm394_vm0, %v375_v27 }
  0x47   : > { %1392 = vmatmul.msk.f32.gmra.mxu2 %vm394_vm0, %v388_v28  ;;  %1400 = vmatmul.msk.f32.gmra.mxu3 %vm394_vm0, %v388_v28 }
  0x4b   : > { %1368 = vmatmul.msk.f32.gmra.mxu0 %vm394_vm0, %v376_v29  ;;  %1380 = vmatmul.msk.f32.gmra.mxu1 %vm394_vm0, %v376_v29 }
  0x4f   : > { %1393 = vmatmul.msk.f32.gmra.mxu2 %vm394_vm0, %v389_v30  ;;  %1401 = vmatmul.msk.f32.gmra.mxu3 %vm394_vm0, %v389_v30 }
  0x53   : > { %1369 = vmatmul.msk.f32.gmra.mxu0 %vm394_vm0, %v377_v31  ;;  %1381 = vmatmul.msk.f32.gmra.mxu1 %vm394_vm0, %v377_v31 }
  0x98   : > { %v448_v32 = vpop.f32.mrf.mxu0  ;;  %v501_v33 = vpop.f32.mrf.mxu1 }
  0x9a   : > { %v578_v34 = vpop.f32.mrf.mxu2  ;;  %v619_v35 = vpop.f32.mrf.mxu3 }
  0x9b   : > { %v1752_v36 = vadd.f32 %v578_v34, %v448_v32  ;;  %v1754_v37 = vadd.f32 %v619_v35, %v501_v33 }
  0xa0   : > { %v451_v38 = vpop.f32.mrf.mxu0  ;;  %v504_v39 = vpop.f32.mrf.mxu1 }
  0xa2   : > { %v581_v40 = vpop.f32.mrf.mxu2  ;;  %v622_v41 = vpop.f32.mrf.mxu3 }
  0xa3   : > { %v1756_v42 = vadd.f32 %v581_v40, %v451_v38  ;;  %v1758_v43 = vadd.f32 %v622_v41, %v504_v39 }
  0xa8   : > { %v454_v44 = vpop.f32.mrf.mxu0  ;;  %v507_v45 = vpop.f32.mrf.mxu1 }
  0xaa   : > { %v584_v46 = vpop.f32.mrf.mxu2  ;;  %v625_v47 = vpop.f32.mrf.mxu3 }
  0xab   : > { %v1760_v48 = vadd.f32 %v584_v46, %v454_v44  ;;  %v1762_v49 = vadd.f32 %v625_v47, %v507_v45 }
  0xb0   : > { %v457_v50 = vpop.f32.mrf.mxu0  ;;  %v510_v51 = vpop.f32.mrf.mxu1 }
  0xb2   : > { %v587_v52 = vpop.f32.mrf.mxu2  ;;  %v628_v53 = vpop.f32.mrf.mxu3 }
  0xb3   : > { %v1764_v54 = vadd.f32 %v587_v52, %v457_v50  ;;  %v1766_v55 = vadd.f32 %v628_v53, %v510_v51 }
  0xb8   : > { %v460_v56 = vpop.f32.mrf.mxu0  ;;  %v513_v57 = vpop.f32.mrf.mxu1 }
  0xba   : > { %v590_v58 = vpop.f32.mrf.mxu2  ;;  %v631_v59 = vpop.f32.mrf.mxu3 }
  0xbb   : > { %v803_v60 = vadd.f32 %v590_v58, %v460_v56  ;;  %v804_v62 = vadd.f32 %v631_v59, %v513_v57  ;;  %v378_v59 = vld [vmem:[%s2293_s2 + $0x40] sm:$0xff] }
  0xbc   : > { %1370 = vmatmul.msk.f32.gmra.mxu0 %vm394_vm0, %v378_v59  ;;  %1382 = vmatmul.msk.f32.gmra.mxu1 %vm394_vm0, %v378_v59 }
  0xbd   : > { %v1410_v61 = vmul.f32 -1.442695, %v803_v60  ;;  %v1411_v9 = vmul.f32 -1.442695, %v804_v62 }
  0xbf   : > { %1460 = vpow2.f32 %v1410_v61 }
  0xc0   : > { %v463_v63 = vpop.f32.mrf.mxu0  ;;  %v516_v6 = vpop.f32.mrf.mxu1  ;;  %1462 = vpow2.f32 %v1411_v9 }
  0xc2   : > { %v593_v7 = vpop.f32.mrf.mxu2  ;;  %v634_v8 = vpop.f32.mrf.mxu3 }
  0xc3   : > { %v805_v12 = vadd.f32 %v593_v7, %v463_v63  ;;  %v806_v13 = vadd.f32 %v634_v8, %v516_v6 }
  0xc5   : > { %v1412_v14 = vmul.f32 -1.442695, %v805_v12  ;;  %v1413_v15 = vmul.f32 -1.442695, %v806_v13  ;;  %v1461_v16 = vpop.eup %1460 }
  0xc6   : > { %v1768_v19 = vadd.f32 1.0, %v1461_v16  ;;  %v1463_v24 = vpop.eup %1462 }
  0xc7   : > { %1464 = vpow2.f32 %v1412_v14  ;;  %v1771_v29 = vadd.f32 1.0, %v1463_v24 }
  0xc8   : > { %v466_v17 = vpop.f32.mrf.mxu0  ;;  %v519_v18 = vpop.f32.mrf.mxu1  ;;  %1466 = vpow2.f32 %v1413_v15  ;;  %v854_v56 = vand.u32 2147483648, %v1768_v19  ;;  %vm848_vm1 = vweird.f32 %v1768_v19  ;;  %v852_v9 = vand.u32 2147483647, %v1768_v19 }
  0xc9   : > { %1468 = vrcp.f32 %v1768_v19  ;;  %v867_v13 = vand.u32 2147483647, %v1771_v29 }
  0xca   : > { %v596_v20 = vpop.f32.mrf.mxu2  ;;  %v637_v21 = vpop.f32.mrf.mxu3  ;;  %v1814_v12 = vor.u32 1.1754944e-38, %v854_v56  ;;  %vm1904_vm15 = vcmp.eq.f32.partialorder %v852_v9, 8.507059e+37  ;;  %v380_v9 = vld [vmem:[%s2293_s2 + $0x50] sm:$0xff] }
  0xcb   : > { %v807_v22 = vadd.f32 %v596_v20, %v466_v17  ;;  %v808_v23 = vadd.f32 %v637_v21, %v519_v18 }
  0xcd   : > { %v1414_v25 = vmul.f32 -1.442695, %v807_v22  ;;  %v1415_v26 = vmul.f32 -1.442695, %v808_v23  ;;  %v1465_v27 = vpop.eup %1464  ;;  %v869_v22 = vand.u32 2147483648, %v1771_v29 }
  0xce   : > { %v1467_v28 = vpop.eup %1466  ;;  %v1773_v32 = vadd.f32 1.0, %v1465_v27 }
  0xcf   : > { %1470 = vpow2.f32 %v1414_v25  ;;  %v1775_v33 = vadd.f32 1.0, %v1467_v28  ;;  %v1777_v40 = vpop.eup %1468 }
  0xd0   : > { %v469_v30 = vpop.f32.mrf.mxu0  ;;  %v522_v31 = vpop.f32.mrf.mxu1  ;;  %1472 = vpow2.f32 %v1415_v26  ;;  %v844_v51 = vmul.f32 %v1777_v40, %v1768_v19  ;;  %v884_v21 = vand.u32 2147483648, %v1773_v32  ;;  %vm849_vm2 = vweird.f32 %v1777_v40 }
  0xd1   : > { %1474 = vrcp.f32 %v1771_v29  ;;  %vm878_vm3 = vweird.f32 %v1773_v32  ;;  %v882_v28 = vand.u32 2147483647, %v1773_v32  ;;  %vm1865_vm9 = vmor %vm848_vm1, %vm849_vm2 }
  0xd2   : > { %v599_v34 = vpop.f32.mrf.mxu2  ;;  %v640_v35 = vpop.f32.mrf.mxu3  ;;  %1476 = vrcp.f32 %v1773_v32  ;;  %v845_v58 = vsub.f32 1.0, %v844_v51 }
  0xd3   : > { %v809_v38 = vadd.f32 %v599_v34, %v469_v30  ;;  %v810_v39 = vadd.f32 %v640_v35, %v522_v31  ;;  %1478 = vrcp.f32 %v1775_v33  ;;  %v897_v31 = vand.u32 2147483647, %v1775_v33  ;;  %v379_v35 = vld [vmem:[%s2293_s2 + $0x48] sm:$0xff] }
  0xd4   : > { %v846_v17 = vmul.f32 %v1777_v40, %v845_v58  ;;  %1371 = vmatmul.msk.f32.gmra.mxu0 %vm394_vm0, %v379_v35  ;;  %1383 = vmatmul.msk.f32.gmra.mxu1 %vm394_vm0, %v379_v35  ;;  %vm1884_vm14 = vcmp.eq.f32.partialorder %v882_v28, 8.507059e+37  ;;  %v1181_v28 = vld [vmem:[%s2297_s6 + $0x18] sm:$0xff] }
  0xd5   : > { %v1471_v41 = vpop.eup %1470  ;;  %v1416_v44 = vmul.f32 -1.442695, %v809_v38  ;;  %v1417_v45 = vmul.f32 -1.442695, %v810_v39 }
  0xd6   : > { %v1782_v46 = vadd.f32 1.0, %v1471_v41  ;;  %v1473_v47 = vpop.eup %1472  ;;  %v1837_v34 = vadd.f32 %v1777_v40, %v846_v17  ;;  %v1844_v41 = vor.u32 1.1754944e-38, %v884_v21  ;;  %v1178_v21 = vld [vmem:[%s2297_s6] sm:$0xff] }
  0xd7   : > { %1480 = vpow2.f32 %v1416_v44  ;;  %v1785_v50 = vadd.f32 1.0, %v1473_v47  ;;  %v1789_v52 = vpop.eup %1474  ;;  %v899_v44 = vand.u32 2147483648, %v1775_v33 }
  0xd8   : > { %1482 = vrcp.f32 %v1782_v46  ;;  %v1792_v53 = vpop.eup %1476  ;;  %v859_v6 = vmul.f32 %v1789_v52, %v1771_v29  ;;  %v912_v25 = vand.u32 2147483647, %v1782_v46  ;;  %v914_v26 = vand.u32 2147483648, %v1782_v46 }
  0xd9   : > { %1484 = vpow2.f32 %v1417_v45  ;;  %v1795_v57 = vpop.eup %1478  ;;  %v874_v63 = vmul.f32 %v1792_v53, %v1773_v32  ;;  %v927_v39 = vand.u32 2147483647, %v1785_v50  ;;  %vm908_vm4 = vweird.f32 %v1782_v46 }
  0xda   : > { %1486 = vrcp.f32 %v1785_v50  ;;  %v889_v16 = vmul.f32 %v1795_v57, %v1775_v33  ;;  %v860_v24 = vsub.f32 1.0, %v859_v6  ;;  %vm879_vm5 = vweird.f32 %v1792_v53 }
  0xdb   : > { %v875_v23 = vsub.f32 1.0, %v874_v63  ;;  %vm1855_vm7 = vcmp.eq.f32.partialorder %v912_v25, 8.507059e+37  ;;  %v915_v59 = vor.u32 1.1754944e-38, %v914_v26  ;;  %vm923_vm8 = vweird.f32 %v1785_v50 }
  0xdc   : > { %v890_v30 = vsub.f32 1.0, %v889_v16  ;;  %v861_v51 = vmul.f32 %v1789_v52, %v860_v24  ;;  %vm894_vm11 = vweird.f32 %v1795_v57  ;;  %v851_v16 = vsel %vm1865_vm9, %v1777_v40, %v1837_v34  ;;  %vm1898_vm9 = vmor %vm878_vm3, %vm879_vm5  ;;  %1372 = vmatmul.msk.f32.gmra.mxu0 %vm394_vm0, %v380_v9  ;;  %1384 = vmatmul.msk.f32.gmra.mxu1 %vm394_vm0, %v380_v9  ;;  %v1180_v34 = vld [vmem:[%s2297_s6 + $0x10] sm:$0xff] }
  0xdd   : > { %v1481_v60 = vpop.eup %1480  ;;  %v876_v47 = vmul.f32 %v1792_v53, %v875_v23  ;;  %vm1880_vm13 = vcmp.eq.f32.partialorder %v927_v39, 8.507059e+37  ;;  %v900_v58 = vor.u32 1.1754944e-38, %v899_v44  ;;  %v391_v23 = vld [vmem:[%s2295_s4 + $0x8] sm:$0xff]  ;;  %v1403_v32 = vmul.f32 -1.442695, %v1754_v37 }
  0xde   : > { %v1802_v61 = vpop.eup %1482  ;;  %v1804_v62 = vadd.f32 1.0, %v1481_v60  ;;  %v1405_v9 = vmul.f32 -1.442695, %v1758_v43 }
  0xdf   : > { %v1485_v7 = vpop.eup %1484  ;;  %v904_v8 = vmul.f32 %v1802_v61, %v1782_v46  ;;  %vm909_vm12 = vweird.f32 %v1802_v61  ;;  %v877_v25 = vadd.f32 %v1792_v53, %v876_v47 }
  0xe0   : > { %v1817_v14 = vpop.eup %1486  ;;  %1488 = vrcp.f32 %v1804_v62  ;;  %v1820_v15 = vadd.f32 1.0, %v1485_v7  ;;  %v929_v7 = vand.u32 2147483648, %v1785_v50  ;;  %v942_v24 = vand.u32 2147483647, %v1804_v62  ;;  %vm1915_vm3 = vmor %vm908_vm4, %vm909_vm12 }
  0xe1   : > { %v905_v18 = vsub.f32 1.0, %v904_v8  ;;  %v919_v20 = vmul.f32 %v1817_v14, %v1785_v50  ;;  %v891_v8 = vmul.f32 %v1795_v57, %v890_v30  ;;  %v944_v40 = vand.u32 2147483648, %v1804_v62 }
  0xe2   : > { %1490 = vrcp.f32 %v1820_v15  ;;  %vm924_vm1 = vweird.f32 %v1817_v14  ;;  %vm938_vm10 = vweird.f32 %v1804_v62  ;;  %v957_v35 = vand.u32 2147483647, %v1820_v15 }
  0xe3   : > { %v920_v27 = vsub.f32 1.0, %v919_v20  ;;  %v906_v38 = vmul.f32 %v1802_v61, %v905_v18  ;;  %v892_v19 = vadd.f32 %v1795_v57, %v891_v8  ;;  %vm1930_vm4 = vmor %vm923_vm8, %vm924_vm1  ;;  %vm943_vm6 = vcmp.eq.f32.partialorder %v942_v24, 8.507059e+37 }
  0xe4   : > { %vm953_vm8 = vweird.f32 %v1820_v15 }
  0xe5   : > { %v921_v60 = vmul.f32 %v1817_v14, %v920_v27  ;;  %v907_v20 = vadd.f32 %v1802_v61, %v906_v38  ;;  %v959_v38 = vand.u32 2147483648, %v1820_v15 }
  0xe6   : > { %v1489_v45 = vpop.eup %1488 }
  0xe7   : > { %v934_v56 = vmul.f32 %v1489_v45, %v1804_v62  ;;  %vm939_vm2 = vweird.f32 %v1489_v45  ;;  %v922_v30 = vadd.f32 %v1817_v14, %v921_v60  ;;  %v911_v47 = vsel %vm1915_vm3, %v1802_v61, %v907_v20 }
  0xe8   : > { %v1491_v6 = vpop.eup %1490  ;;  %vm940_vm12 = vmor %vm938_vm10, %vm939_vm2  ;;  %v881_v61 = vsel %vm1898_vm9, %v1792_v53, %v877_v25  ;;  %v862_v60 = vadd.f32 %v1789_v52, %v861_v51  ;;  %vm2315_vm10 = vweird.f32 %v1775_v33  ;;  %v960_v53 = vor.u32 1.1754944e-38, %v959_v38 }
  0xe9   : > { %v935_v17 = vsub.f32 1.0, %v934_v56  ;;  %v949_v18 = vmul.f32 %v1491_v6, %v1820_v15  ;;  %vm954_vm5 = vweird.f32 %v1491_v6  ;;  %v945_v56 = vor.u32 1.1754944e-38, %v944_v40  ;;  %vm1949_vm1 = vmor %vm2315_vm10, %vm894_vm11 }
  0xea   : > { %v926_v8 = vsel %vm1930_vm4, %v1817_v14, %v922_v30  ;;  %vm955_vm2 = vmor %vm953_vm8, %vm954_vm5  ;;  %v930_v15 = vor.u32 1.1754944e-38, %v929_v7  ;;  %vm958_vm9 = vcmp.eq.f32.partialorder %v957_v35, 8.507059e+37  ;;  %v896_v14 = vsel %vm1949_vm1, %v1795_v57, %v892_v19  ;;  %v392_v30 = vld [vmem:[%s2295_s4 + $0x10] sm:$0xff]  ;;  %v393_v35 = vld [vmem:[%s2295_s4 + $0x18] sm:$0xff] }
  0xeb   : > { %v936_v26 = vmul.f32 %v1489_v45, %v935_v17  ;;  %v950_v27 = vsub.f32 1.0, %v949_v18  ;;  %v886_v25 = vsel %vm1884_vm14, %v1844_v41, %v881_v61  ;;  %v870_v7 = vor.u32 1.1754944e-38, %v869_v22 }
  0xec   : > { %v931_v40 = vsel %vm1880_vm13, %v930_v15, %v926_v8  ;;  %vm898_vm13 = vcmp.eq.f32.partialorder %v897_v31, 8.507059e+37  ;;  %v965_v33 = vmul.f32 %v886_v25, %v1647_v4  ;;  %vm868_vm14 = vcmp.eq.f32.partialorder %v867_v13, 8.507059e+37  ;;  %v1174_v31 = vld [vmem:[%s2296_s5] sm:$0xff] }
  0xed   : > { %v937_v39 = vadd.f32 %v1489_v45, %v936_v26  ;;  %v951_v62 = vmul.f32 %v1491_v6, %v950_v27  ;;  %v901_v44 = vsel %vm898_vm13, %v900_v58, %v896_v14  ;;  %v1558_v13 = vmov 0   ;;  %v1177_v26 = vld [vmem:[%s2296_s5 + $0x18] sm:$0xff]  ;;  %v1175_v27 = vld [vmem:[%s2296_s5 + $0x8] sm:$0xff] }
  0xee   : > { %1458 = vset.pattern.permute.xlu1 %v1558_v13  ;;  %1457 = vset.pattern.permute.xlu0 %v1558_v13  ;;  %v1402_v38 = vmul.f32 -1.442695, %v1752_v36  ;;  %v1404_v19 = vmul.f32 -1.442695, %v1756_v42  ;;  %v1409_v8 = vmul.f32 -1.442695, %v1766_v55 }
  0xef   : > { %v941_v63 = vsel %vm940_vm12, %v1489_v45, %v937_v39  ;;  %v952_v50 = vadd.f32 %v1491_v6, %v951_v62  ;;  %v916_v45 = vsel %vm1855_vm7, %v915_v59, %v911_v47  ;;  %vm2319_vm7 = vweird.f32 %v1771_v29  ;;  %v1176_v29 = vld [vmem:[%s2296_s5 + $0x10] sm:$0xff]  ;;  %1184 = vperm.xlu0 %1457, %v1174_v31   ;;  %1459 = vset.pattern.permute.xlu2 %v1558_v13 }
  0xf0   : > { %v946_v18 = vsel %vm943_vm6, %v945_v56, %v941_v63  ;;  %vm2318_vm6 = vweird.f32 %v1789_v52  ;;  %v967_v59 = vmul.f32 %v916_v45, %v1639_v2  ;;  %v968_v2 = vmul.f32 %v931_v40, %v1644_v3  ;;  %v390_v3 = vld [vmem:[%s2295_s4] sm:$0xff]  ;;  %1194 = vperm.xlu1 %1458, %v1176_v29   ;;  %1212 = vperm.xlu2 %1459, %v1178_v21  }
  0xf1   : > { %v969_v51 = vmul.f32 %v946_v18, %v1633_v0  ;;  %v956_v20 = vsel %vm955_vm2, %v1491_v6, %v952_v50  ;;  %vm1971_vm11 = vmor %vm2319_vm7, %vm2318_vm6  ;;  %v856_v6 = vsel %vm1904_vm15, %v1814_v12, %v851_v16  ;;  %v966_v12 = vmul.f32 %v901_v44, %v1650_v5 }
  0xf2   : > { %v961_v24 = vsel %vm958_vm9, %v960_v53, %v956_v20  ;;  %v866_v41 = vsel %vm1971_vm11, %v1789_v52, %v862_v60  ;;  %v963_v22 = vmul.f32 %v856_v6, %v1659_v10  ;;  %1492 = vpow2.f32 %v1402_v38 }
  0xf3   : > { %995 = vmatpush.msrb.mxu2 %v969_v51  ;;  %v970_v57 = vmul.f32 %v961_v24, %v1636_v1  ;;  %v381_v1 = vld [vmem:[%s2293_s2 + $0x58] sm:$0xff]  ;;  %v871_v52 = vsel %vm868_vm14, %v870_v7, %v866_v41  ;;  %1494 = vpow2.f32 %v1403_v32  ;;  %v1406_v39 = vmul.f32 -1.442695, %v1760_v48 }
  0xf4   : > { %1373 = vmatmul.msk.f32.gmra.mxu0 %vm394_vm0, %v381_v1  ;;  %1385 = vmatmul.msk.f32.gmra.mxu1 %vm394_vm0, %v381_v1  ;;  %v964_v16 = vmul.f32 %v871_v52, %v1662_v11  ;;  %1496 = vpow2.f32 %v1404_v19  ;;  %v1407_v56 = vmul.f32 -1.442695, %v1762_v49  ;;  %v1408_v48 = vmul.f32 -1.442695, %v1764_v54  ;;  %v1179_v49 = vld [vmem:[%s2297_s6 + $0x8] sm:$0xff] }
  0xf5   : > { %1024 = vmatpush.msrb.mxu3 %v970_v57  ;;  %996 = vmatpush.msrb.mxu2 %v967_v59  ;;  %1498 = vpow2.f32 %v1405_v9 }
  0xf6   : > { %1500 = vpow2.f32 %v1406_v39 }
  0xf7   : > { %1025 = vmatpush.msrb.mxu3 %v968_v2  ;;  %997 = vmatpush.msrb.mxu2 %v965_v33  ;;  %1502 = vpow2.f32 %v1407_v56 }
  0xf8   : > { %1199 = vperm.xlu1 %1458, %v1177_v26   ;;  %1189 = vperm.xlu0 %1457, %v1175_v27   ;;  %v1493_v62 = vpop.eup %1492 }
  0xf9   : > { %1026 = vmatpush.msrb.mxu3 %v966_v12  ;;  %998 = vmatpush.msrb.mxu2 %v963_v22  ;;  %v1495_v47 = vpop.eup %1494  ;;  %v2046_v36 = vadd.f32 1.0, %v1493_v62 }
  0xfa   : > { %1418 = vmatmul.msk.f32.vlgmr.msrb.gmra.mxu2 %vm394_vm0, %v390_v3  ;;  %v1497_v46 = vpop.eup %1496  ;;  %v2048_v37 = vadd.f32 1.0, %v1495_v47  ;;  %1217 = vperm.xlu2 %1459, %v1179_v49  }
  0xfb   : > { %1027 = vmatpush.msrb.mxu3 %v964_v16  ;;  %v1499_v61 = vpop.eup %1498  ;;  %v2050_v42 = vadd.f32 1.0, %v1497_v46  ;;  %1504 = vrcp.f32 %v2046_v36  ;;  %v694_v2 = vand.u32 2147483648, %v2046_v36  ;;  %v692_v12 = vand.u32 2147483647, %v2046_v36 }
  0xfc   : > { %1422 = vmatmul.msk.f32.vlgmr.msrb.gmra.mxu3 %vm394_vm0, %v390_v3  ;;  %v2052_v43 = vadd.f32 1.0, %v1499_v61  ;;  %v1501_v60 = vpop.eup %1500  ;;  %1506 = vrcp.f32 %v2048_v37  ;;  %vm703_vm15 = vweird.f32 %v2048_v37  ;;  %v707_v29 = vand.u32 2147483647, %v2048_v37 }
  0xfd   : > { %1508 = vrcp.f32 %v2050_v42  ;;  %v2062_v63 = vadd.f32 1.0, %v1501_v60  ;;  %v1503_v50 = vpop.eup %1502  ;;  %v709_v26 = vand.u32 2147483648, %v2048_v37  ;;  %vm718_vm8 = vweird.f32 %v2050_v42 }
  0xfe   : > { %1510 = vrcp.f32 %v2052_v43  ;;  %v2072_v54 = vadd.f32 1.0, %v1503_v50  ;;  %v722_v19 = vand.u32 2147483647, %v2050_v42  ;;  %v739_v9 = vand.u32 2147483648, %v2052_v43 }
  0xff   : > { %1512 = vpow2.f32 %v1408_v48  ;;  %vm733_vm9 = vweird.f32 %v2052_v43  ;;  %v737_v46 = vand.u32 2147483647, %v2052_v43  ;;  %vm693_vm6 = vcmp.eq.f32.partialorder %v692_v12, 8.507059e+37 }
 0x100   : > { %1227 = vperm.xlu1 %1458, %v1181_v28   ;;  %1222 = vperm.xlu0 %1457, %v1180_v34   ;;  %1514 = vrcp.f32 %v2062_v63  ;;  %v724_v28 = vand.u32 2147483648, %v2050_v42  ;;  %vm708_vm7 = vcmp.eq.f32.partialorder %v707_v29, 8.507059e+37  ;;  %v710_v61 = vor.u32 1.1754944e-38, %v709_v26 }
 0x101   : > { %v2065_v17 = vpop.eup %1504  ;;  %1516 = vpow2.f32 %v1409_v8  ;;  %vm723_vm13 = vcmp.eq.f32.partialorder %v722_v19, 8.507059e+37  ;;  %vm738_vm14 = vcmp.eq.f32.partialorder %v737_v46, 8.507059e+37 }
 0x102   : > { %1419 = vmatmul.msk.f32.gmra.mxu2 %vm394_vm0, %v391_v23  ;;  %v2067_v18 = vpop.eup %1506  ;;  %v684_v15 = vmul.f32 %v2065_v17, %v2046_v36  ;;  %1518 = vrcp.f32 %v2072_v54  ;;  %vm689_vm3 = vweird.f32 %v2065_v17 }
 0x103   : > { %v2069_v53 = vpop.eup %1508  ;;  %v699_v55 = vmul.f32 %v2067_v18, %v2048_v37  ;;  %vm704_vm5 = vweird.f32 %v2067_v18 }
 0x104   : > { %1423 = vmatmul.msk.f32.gmra.mxu3 %vm394_vm0, %v391_v23  ;;  %v2074_v45 = vpop.eup %1510  ;;  %v714_v51 = vmul.f32 %v2069_v53, %v2050_v42  ;;  %v685_v24 = vsub.f32 1.0, %v684_v15  ;;  %v695_v23 = vor.u32 1.1754944e-38, %v694_v2  ;;  %vm719_vm4 = vweird.f32 %v2069_v53  ;;  %vm2136_vm1 = vmor %vm703_vm15, %vm704_vm5 }
 0x105   : > { %v1513_v20 = vpop.eup %1512  ;;  %v729_v14 = vmul.f32 %v2074_v45, %v2052_v43  ;;  %v700_v25 = vsub.f32 1.0, %v699_v55  ;;  %vm734_vm10 = vweird.f32 %v2074_v45  ;;  %vm2145_vm2 = vmor %vm718_vm8, %vm719_vm4  ;;  %v725_v43 = vor.u32 1.1754944e-38, %v724_v28 }
 0x106   : > { %v2085_v40 = vpop.eup %1514  ;;  %v2087_v0 = vadd.f32 1.0, %v1513_v20  ;;  %v715_v57 = vsub.f32 1.0, %v714_v51  ;;  %v686_v41 = vmul.f32 %v2065_v17, %v685_v24  ;;  %vm2157_vm11 = vmor %vm733_vm9, %vm734_vm10  ;;  %vm748_vm15 = vweird.f32 %v2062_v63 }
 0x107   : > { %v1517_v58 = vpop.eup %1516  ;;  %v730_v59 = vsub.f32 1.0, %v729_v14  ;;  %v701_v7 = vmul.f32 %v2067_v18, %v700_v25  ;;  %v744_v1 = vmul.f32 %v2085_v40, %v2062_v63  ;;  %vm763_vm4 = vweird.f32 %v2072_v54 }
 0x108   : > { %v2090_v44 = vpop.eup %1518  ;;  %v2092_v6 = vadd.f32 1.0, %v1517_v58  ;;  %1520 = vrcp.f32 %v2087_v0  ;;  %v716_v33 = vmul.f32 %v2069_v53, %v715_v57  ;;  %v687_v3 = vadd.f32 %v2065_v17, %v686_v41 }
 0x109   : > { %v731_v22 = vmul.f32 %v2074_v45, %v730_v59  ;;  %v759_v13 = vmul.f32 %v2090_v44, %v2072_v54  ;;  %v702_v16 = vadd.f32 %v2067_v18, %v701_v7  ;;  %v745_v21 = vsub.f32 1.0, %v744_v1 }
 0x10a   : > { %1420 = vmatmul.msk.f32.gmra.mxu2 %vm394_vm0, %v392_v30  ;;  %1522 = vrcp.f32 %v2092_v6  ;;  %v717_v27 = vadd.f32 %v2069_v53, %v716_v33  ;;  %v752_v57 = vand.u32 2147483647, %v2062_v63  ;;  %vm764_vm5 = vweird.f32 %v2090_v44 }
 0x10b   : > { %v732_v34 = vadd.f32 %v2074_v45, %v731_v22  ;;  %v760_v39 = vsub.f32 1.0, %v759_v13  ;;  %v706_v62 = vsel %vm2136_vm1, %v2067_v18, %v702_v16  ;;  %v746_v56 = vmul.f32 %v2085_v40, %v745_v21  ;;  %vm2192_vm8 = vmor %vm763_vm4, %vm764_vm5 }
 0x10c   : > { %1424 = vmatmul.msk.f32.gmra.mxu3 %vm394_vm0, %v392_v30  ;;  %v711_v8 = vsel %vm708_vm7, %v710_v61, %v706_v62  ;;  %v767_v22 = vand.u32 2147483647, %v2072_v54  ;;  %v784_v61 = vand.u32 2147483648, %v2087_v0  ;;  %vm793_vm7 = vweird.f32 %v2092_v6 }
 0x10d   : > { %v736_v49 = vsel %vm2157_vm11, %v2074_v45, %v732_v34  ;;  %v761_v18 = vmul.f32 %v2090_v44, %v760_v39  ;;  %v747_v51 = vadd.f32 %v2085_v40, %v746_v56  ;;  %v754_v45 = vand.u32 2147483648, %v2062_v63 }
 0x10e   : > { %v1050_v25 = vsub.f32 1.0, %v711_v8  ;;  %v769_v63 = vand.u32 2147483648, %v2072_v54  ;;  %vm768_vm10 = vcmp.eq.f32.partialorder %v767_v22, 8.507059e+37  ;;  %v782_v56 = vand.u32 2147483647, %v2087_v0 }
 0x10f   : > { %v762_v2 = vadd.f32 %v2090_v44, %v761_v18 }
 0x110   : > { %v1058_v16 = vmul.f32 %v1050_v25, %v1662_v11  ;;  %v770_v28 = vor.u32 1.1754944e-38, %v769_v63 }
 0x111   : > { %v766_v54 = vsel %vm2192_vm8, %v2090_v44, %v762_v2 }
 0x112   : > { %1421 = vmatmul.msk.f32.gmra.mxu2 %vm394_vm0, %v393_v35  ;;  %v771_v62 = vsel %vm768_vm10, %v770_v28, %v766_v54 }
 0x114   : > { %1425 = vmatmul.msk.f32.gmra.mxu3 %vm394_vm0, %v393_v35  ;;  %vm688_vm0 = vweird.f32 %v2046_v36  ;;  %v2129_v35 = vpop.eup %1520  ;;  %v721_v36 = vsel %vm2145_vm2, %v2069_v53, %v717_v27  ;;  %vm778_vm2 = vweird.f32 %v2087_v0 }
 0x115   : > { %vm2121_vm12 = vmor %vm688_vm0, %vm689_vm3  ;;  %v2161_v42 = vpop.eup %1522  ;;  %v774_v50 = vmul.f32 %v2129_v35, %v2087_v0  ;;  %v726_v55 = vsel %vm723_vm13, %v725_v43, %v721_v36  ;;  %vm749_vm0 = vweird.f32 %v2085_v40  ;;  %vm779_vm1 = vweird.f32 %v2129_v35 }
 0x116   : > { %v691_v38 = vsel %vm2121_vm12, %v2065_v17, %v687_v3  ;;  %v740_v17 = vor.u32 1.1754944e-38, %v739_v9  ;;  %v789_v24 = vmul.f32 %v2161_v42, %v2092_v6  ;;  %v1051_v7 = vsub.f32 1.0, %v726_v55  ;;  %vm2177_vm3 = vmor %vm748_vm15, %vm749_vm0 }
 0x117   : > { %v696_v60 = vsel %vm693_vm6, %v695_v23, %v691_v38  ;;  %v775_v59 = vsub.f32 1.0, %v774_v50  ;;  %v751_v12 = vsel %vm2177_vm3, %v2085_v40, %v747_v51  ;;  %v755_v3 = vor.u32 1.1754944e-38, %v754_v45  ;;  %vm2219_vm6 = vmor %vm778_vm2, %vm779_vm1 }
 0x118   : > { %v1049_v20 = vsub.f32 1.0, %v696_v60  ;;  %v741_v14 = vsel %vm738_vm14, %v740_v17, %v736_v49  ;;  %v790_v29 = vsub.f32 1.0, %v789_v24  ;;  %vm753_vm12 = vcmp.eq.f32.partialorder %v752_v57, 8.507059e+37 }
 0x119   : > { %v1052_v33 = vsub.f32 1.0, %v741_v14  ;;  %v776_v40 = vmul.f32 %v2129_v35, %v775_v59  ;;  %v756_v30 = vsel %vm753_vm12, %v755_v3, %v751_v12  ;;  %vm794_vm9 = vweird.f32 %v2161_v42  ;;  %v1531_v59 = vld [vmem:[%s1624_s8 + $0x28] sm:$0xff] }
 0x11a   : > { %v1057_v13 = vmul.f32 %v1049_v20, %v1659_v10  ;;  %v791_v19 = vmul.f32 %v2161_v42, %v790_v29  ;;  %v1053_v39 = vsub.f32 1.0, %v756_v30  ;;  %v1054_v50 = vsub.f32 1.0, %v771_v62  ;;  %vm795_vm11 = vmor %vm793_vm7, %vm794_vm9 }
 0x11b   : > { %v1060_v11 = vmul.f32 %v1052_v33, %v1650_v5  ;;  %v777_v47 = vadd.f32 %v2129_v35, %v776_v40  ;;  %vm783_vm13 = vcmp.eq.f32.partialorder %v782_v56, 8.507059e+37 }
 0x11c   : > { %v792_v43 = vadd.f32 %v2161_v42, %v791_v19 }
 0x11d   : > { %v781_v0 = vsel %vm2219_vm6, %v2129_v35, %v777_v47 }
 0x11e   : > { %v796_v24 = vsel %vm795_vm11, %v2161_v42, %v792_v43 }
 0x139   : > { %v2100_v52 = vpop.f32.mrf.mxu0  ;;  %v2112_v31 = vpop.f32.mrf.mxu1 }
 0x151   : > { %v475_v15 = vpop.f32.mrf.mxu0  ;;  %v528_v58 = vpop.f32.mrf.mxu1 }
 0x159   : > { %v478_v9 = vpop.f32.mrf.mxu0  ;;  %v531_v5 = vpop.f32.mrf.mxu1 }
 0x171   : > { %v534_v63 = vpop.f32.mrf.mxu1 }
 0x17d   : > { %v1000_v48 = vpop.f32.mrf.mxu2 }
 0x17e   : > { %v1041_v41 = vadd.f32 %v1000_v48, %v2100_v52 }
 0x17f   : > { %v1029_v53 = vpop.f32.mrf.mxu3 }
 0x180   : > { %v1042_v52 = vadd.f32 %v1029_v53, %v2112_v31  ;;  %v1065_v26 = vmul.f32 %v1041_v41, %v696_v60  ;;  %v1059_v31 = vmul.f32 %v1051_v7, %v1647_v4  ;;  %v1559_v53 = vmov 32.0  }
 0x181   : > { %1524 = vrcp.f32 %v1559_v53  ;;  %v1062_v41 = vmul.f32 %v1531_v59, %v1054_v50 }
 0x182   : > { %v1066_v34 = vmul.f32 %v1042_v52, %v711_v8  ;;  %v2205_v44 = vadd.f32 %v1065_v26, %v1057_v13  ;;  %v799_v8 = vand.u32 2147483648, %v2092_v6 }
 0x184   : > { %v2213_v36 = vadd.f32 %v1066_v34, %v1058_v16 }
 0x185   : > { %v1003_v21 = vpop.f32.mrf.mxu2 }
 0x186   : > { %v1043_v27 = vadd.f32 %v1003_v21, %v475_v15  ;;  %v797_v15 = vand.u32 2147483647, %v2092_v6  ;;  %v481_v6 = vpop.f32.mrf.mxu0  ;;  %v1532_v21 = vld [vmem:[%s1624_s8 + $0x30] sm:$0xff] }
 0x187   : > { %v1032_v10 = vpop.f32.mrf.mxu3  ;;  %v1525_v2 = vpop.eup %1524 }
 0x188   : > { %v1067_v38 = vmul.f32 %v1043_v27, %v726_v55  ;;  %v1044_v32 = vadd.f32 %v1032_v10, %v528_v58  ;;  %v1530_v55 = vld [vmem:[%s1624_s8 + $0x20] sm:$0xff]  ;;  %v800_v58 = vor.u32 1.1754944e-38, %v799_v8  ;;  %vm798_vm14 = vcmp.eq.f32.partialorder %v797_v15, 8.507059e+37 }
 0x189   : > { %v1061_v51 = vmul.f32 %v1530_v55, %v1053_v39  ;;  %v1100_v13 = vmul.f32 32.0, %v1525_v2  ;;  %vm1104_vm0 = vweird.f32 %v1525_v2 }
 0x18a   : > { %v2207_v4 = vadd.f32 %v1067_v38, %v1059_v31  ;;  %v1068_v46 = vmul.f32 %v1044_v32, %v741_v14  ;;  %v785_v14 = vor.u32 1.1754944e-38, %v784_v61  ;;  %v801_v1 = vsel %vm798_vm14, %v800_v58, %v796_v24 }
 0x18b   : > { %v1056_v42 = vsub.f32 1.0, %v801_v1  ;;  %v1101_v10 = vsub.f32 1.0, %v1100_v13 }
 0x18c   : > { %v1081_v37 = vadd.f32 %v2207_v4, %v2205_v44  ;;  %v2217_v60 = vadd.f32 %v1068_v46, %v1060_v11  ;;  %v786_v25 = vsel %vm783_vm13, %v785_v14, %v781_v0 }
 0x18d   : > { %v1006_v49 = vpop.f32.mrf.mxu2  ;;  %v1055_v22 = vsub.f32 1.0, %v786_v25  ;;  %v1102_v32 = vmul.f32 %v1525_v2, %v1101_v10 }
 0x18e   : > { %v1090_v17 = vadd.f32 %v2217_v60, %v2213_v36  ;;  %v1045_v18 = vadd.f32 %v1006_v49, %v478_v9 }
 0x18f   : > { %v1035_v20 = vpop.f32.mrf.mxu3  ;;  %v1063_v23 = vmul.f32 %v1532_v21, %v1055_v22  ;;  %v1103_v47 = vadd.f32 %v1525_v2, %v1102_v32  ;;  %v1213_v32 = vpop.permute.xlu2 %1212 }
 0x190   : > { %v1069_v35 = vmul.f32 %v1045_v18, %v756_v30  ;;  %v1046_v45 = vadd.f32 %v1035_v20, %v531_v5  ;;  %v1533_v30 = vld [vmem:[%s1624_s8 + $0x38] sm:$0xff] }
 0x191   : > { %v1064_v54 = vmul.f32 %v1533_v30, %v1056_v42 }
 0x192   : > { %v1077_v57 = vadd.f32 %v1069_v35, %v1061_v51  ;;  %v1070_v7 = vmul.f32 %v1046_v45, %v771_v62 }
 0x194   : > { %v1082_v33 = vadd.f32 %v1081_v37, %v1077_v57  ;;  %v1078_v12 = vadd.f32 %v1070_v7, %v1062_v41  ;;  %v1105_v37 = vsel %vm1104_vm0, %v1525_v2, %v1103_v47 }
 0x195   : > { %v1009_v52 = vpop.f32.mrf.mxu2 }
 0x196   : > { %v1091_v3 = vadd.f32 %v1090_v17, %v1078_v12  ;;  %v1047_v29 = vadd.f32 %v1009_v52, %v481_v6 }
 0x197   : > { %v1038_v16 = vpop.f32.mrf.mxu3 }
 0x198   : > { %v1071_v40 = vmul.f32 %v1047_v29, %v786_v25  ;;  %v1048_v26 = vadd.f32 %v1038_v16, %v534_v63 }
 0x19a   : > { %v1079_v27 = vadd.f32 %v1071_v40, %v1063_v23  ;;  %v1072_v31 = vmul.f32 %v1048_v26, %v801_v1  ;;  %v1195_v26 = vpop.permute.xlu1 %1194 }
 0x19c   : > { %v1083_v11 = vadd.f32 %v1082_v33, %v1079_v27  ;;  %v1080_v28 = vadd.f32 %v1072_v31, %v1064_v54 }
 0x19e   : > { %v1084_v34 = vrot.slane %v1083_v11, 4  ;;  %v1092_v38 = vadd.f32 %v1091_v3, %v1080_v28 }
 0x1a0   : > { %v1085_v19 = vadd.f32 %v1084_v34, %v1083_v11  ;;  %v1093_v9 = vrot.slane %v1092_v38, 4 }
 0x1a2   : > { %v1086_v39 = vrot.slane %v1085_v19, 2  ;;  %v1094_v62 = vadd.f32 %v1093_v9, %v1092_v38  ;;  %v1200_v9 = vpop.permute.xlu1 %1199 }
 0x1a4   : > { %v1087_v46 = vadd.f32 %v1086_v39, %v1085_v19  ;;  %v1095_v5 = vrot.slane %v1094_v62, 2 }
 0x1a6   : > { %v1088_v56 = vrot.slane %v1087_v46, 1  ;;  %v1096_v61 = vadd.f32 %v1095_v5, %v1094_v62 }
 0x1a8   : > { %v1089_v48 = vadd.f32 %v1088_v56, %v1087_v46  ;;  %v1097_v43 = vrot.slane %v1096_v61, 1 }
 0x1aa   : > { %v1106_v49 = vmul.f32 %v1105_v37, %v1089_v48  ;;  %v1098_v50 = vadd.f32 %v1097_v43, %v1096_v61 }
 0x1ac   : > { %v2240_v0 = vsub.f32 %v2205_v44, %v1106_v49  ;;  %v2243_v8 = vsub.f32 %v2207_v4, %v1106_v49  ;;  %v2245_v17 = vsub.f32 %v1079_v27, %v1106_v49  ;;  %v1107_v18 = vmul.f32 %v1105_v37, %v1098_v50  ;;  %v1185_v27 = vpop.permute.xlu0 %1184 }
 0x1ad   : > { %v2247_v53 = vsub.f32 %v1077_v57, %v1106_v49 }
 0x1ae   : > { %v2250_v15 = vsub.f32 %v2213_v36, %v1107_v18  ;;  %v2253_v55 = vsub.f32 %v2217_v60, %v1107_v18  ;;  %v2255_v51 = vsub.f32 %v1080_v28, %v1107_v18  ;;  %v1113_v20 = vsub.f32 %v1078_v12, %v1107_v18 }
 0x1af   : > { %v1116_v44 = vmul.f32 %v2240_v0, %v2240_v0  ;;  %v1118_v4 = vmul.f32 %v2243_v8, %v2243_v8  ;;  %v1120_v36 = vmul.f32 %v2247_v53, %v2247_v53  ;;  %v1122_v25 = vmul.f32 %v2245_v17, %v2245_v17 }
 0x1b0   : > { %v1117_v14 = vmul.f32 %v2250_v15, %v2250_v15  ;;  %v1119_v35 = vmul.f32 %v2253_v55, %v2253_v55  ;;  %v1121_v45 = vmul.f32 %v1113_v20, %v1113_v20  ;;  %v1123_v57 = vmul.f32 %v2255_v51, %v2255_v51 }
 0x1b1   : > { %v1124_v60 = vadd.f32 %v1118_v4, %v1116_v44 }
 0x1b2   : > { %v1133_v24 = vadd.f32 %v1119_v35, %v1117_v14 }
 0x1b3   : > { %v1125_v58 = vadd.f32 %v1124_v60, %v1120_v36  ;;  %v1218_v60 = vpop.permute.xlu2 %1217 }
 0x1b4   : > { %v1134_v59 = vadd.f32 %v1133_v24, %v1121_v45  ;;  %v1190_v47 = vpop.permute.xlu0 %1189  ;;  %v1228_v24 = vpop.permute.xlu1 %1227 }
 0x1b5   : > { %v1126_v41 = vadd.f32 %v1125_v58, %v1122_v25 }
 0x1b6   : > { %v1135_v7 = vadd.f32 %v1134_v59, %v1123_v57 }
 0x1b7   : > { %v1127_v6 = vrot.slane %v1126_v41, 4 }
 0x1b8   : > { %v1136_v1 = vrot.slane %v1135_v7, 4 }
 0x1b9   : > { %v1128_v2 = vadd.f32 %v1127_v6, %v1126_v41 }
 0x1ba   : > { %v1137_v33 = vadd.f32 %v1136_v1, %v1135_v7 }
 0x1bb   : > { %v1129_v12 = vrot.slane %v1128_v2, 2 }
 0x1bc   : > { %v1138_v22 = vrot.slane %v1137_v33, 2  ;;  %v1223_v58 = vpop.permute.xlu0 %1222 }
 0x1bd   : > { %v1130_v63 = vadd.f32 %v1129_v12, %v1128_v2 }
 0x1be   : > { %v1139_v52 = vadd.f32 %v1138_v22, %v1137_v33 }
 0x1bf   : > { %v1131_v3 = vrot.slane %v1130_v63, 1 }
 0x1c0   : > { %v1140_v29 = vrot.slane %v1139_v52, 1 }
 0x1c1   : > { %v1132_v42 = vadd.f32 %v1131_v3, %v1130_v63 }
 0x1c2   : > { %v1141_v13 = vadd.f32 %v1140_v29, %v1139_v52 }
 0x1c3   : > { %v1142_v16 = vmul.f32 %v1132_v42, %v1105_v37 }
 0x1c4   : > { %v1143_v21 = vmul.f32 %v1141_v13, %v1105_v37 }
 0x1c5   : > { %v1144_v23 = vadd.f32 1e-05, %v1142_v16 }
 0x1c6   : > { %v1145_v40 = vadd.f32 1e-05, %v1143_v21 }
 0x1c7   : > { %1526 = vrsqrt.f32 %v1144_v23  ;;  %vm1152_vm5 = vweird.f32 %v1144_v23 }
 0x1c8   : > { %1528 = vrsqrt.f32 %v1145_v40  ;;  %vm1162_vm12 = vweird.f32 %v1145_v40 }
 0x1cd   : > { %v1527_v30 = vpop.eup %1526 }
 0x1ce   : > { %v1529_v54 = vpop.eup %1528  ;;  %v1147_v31 = vmul.f32 %v1527_v30, %v1144_v23  ;;  %vm1153_vm15 = vweird.f32 %v1527_v30 }
 0x1cf   : > { %v1157_v10 = vmul.f32 %v1529_v54, %v1145_v40  ;;  %vm1163_vm3 = vweird.f32 %v1529_v54  ;;  %vm1154_vm4 = vmor %vm1152_vm5, %vm1153_vm15 }
 0x1d0   : > { %v1148_v11 = vmul.f32 %v1527_v30, %v1147_v31  ;;  %vm1164_vm8 = vmor %vm1162_vm12, %vm1163_vm3 }
 0x1d1   : > { %v1158_v28 = vmul.f32 %v1529_v54, %v1157_v10 }
 0x1d2   : > { %v1149_v34 = vmul.f32 0.5, %v1148_v11 }
 0x1d3   : > { %v1159_v38 = vmul.f32 0.5, %v1158_v28 }
 0x1d4   : > { %v1150_v19 = vsub.f32 1.5, %v1149_v34 }
 0x1d5   : > { %v1160_v39 = vsub.f32 1.5, %v1159_v38 }
 0x1d6   : > { %v1151_v62 = vmul.f32 %v1527_v30, %v1150_v19 }
 0x1d7   : > { %v1161_v46 = vmul.f32 %v1529_v54, %v1160_v39 }
 0x1d8   : > { %v1155_v5 = vsel %vm1154_vm4, %v1527_v30, %v1151_v62 }
 0x1d9   : > { %v1165_v56 = vsel %vm1164_vm8, %v1529_v54, %v1161_v46  ;;  %v1170_v61 = vmul.f32 %v1155_v5, %v2247_v53  ;;  %v1166_v37 = vmul.f32 %v1155_v5, %v2240_v0  ;;  %v1172_v48 = vmul.f32 %v1155_v5, %v2245_v17 }
 0x1da   : > { %v1171_v43 = vmul.f32 %v1165_v56, %v1113_v20  ;;  %v1167_v49 = vmul.f32 %v1165_v56, %v2250_v15  ;;  %v1173_v50 = vmul.f32 %v1165_v56, %v2255_v51  ;;  %v1168_v18 = vmul.f32 %v1155_v5, %v2243_v8 }
 0x1db   : > { %v1202_v44 = vmul.f32 %v1185_v27, %v1166_v37  ;;  %v1208_v4 = vmul.f32 %v1200_v9, %v1172_v48  ;;  %v1169_v14 = vmul.f32 %v1165_v56, %v2253_v55  ;;  %v1206_v36 = vmul.f32 %v1195_v26, %v1170_v61 }
 0x1dc   : > { %v1203_v35 = vmul.f32 %v1185_v27, %v1167_v49  ;;  %v1209_v53 = vmul.f32 %v1200_v9, %v1173_v50  ;;  %v1204_v0 = vmul.f32 %v1190_v47, %v1168_v18  ;;  %v1207_v15 = vmul.f32 %v1195_v26, %v1171_v43 }
 0x1dd   : > { %v1230_v17 = vadd.f32 %v1213_v32, %v1202_v44  ;;  %v1205_v20 = vmul.f32 %v1190_v47, %v1169_v14  ;;  %v1236_v25 = vadd.f32 %v1228_v24, %v1208_v4  ;;  %v1234_v57 = vadd.f32 %v1223_v58, %v1206_v36 }
 0x1de   : > { %v1231_v45 = vadd.f32 %v1213_v32, %v1203_v35  ;;  %v1232_v51 = vadd.f32 %v1218_v60, %v1204_v0  ;;  %v1237_v55 = vadd.f32 %v1228_v24, %v1209_v53  ;;  %v1235_v59 = vadd.f32 %v1223_v58, %v1207_v15 }
 0x1df   : > { %1238 = vst [vmem:[%s352_s23] sm:$0xff] %v1230_v17  ;;  %v1233_v8 = vadd.f32 %v1218_v60, %v1205_v20 }
 0x1e0   : > { %1239 = vst [vmem:[%s352_s23 + $0x8] sm:$0xff] %v1231_v45 }
 0x1e1   : > { %1240 = vst [vmem:[%s352_s23 + $0x10] sm:$0xff] %v1232_v51 }
 0x1e2   : > { %1241 = vst [vmem:[%s352_s23 + $0x18] sm:$0xff] %v1233_v8 }
 0x1e3   : > { %1244 = vst [vmem:[%s352_s23 + $0x30] sm:$0xff] %v1236_v25 }
 0x1e4   : > { %1245 = vst [vmem:[%s352_s23 + $0x38] sm:$0xff] %v1237_v55 }
 0x1e5   : > { %1242 = vst [vmem:[%s352_s23 + $0x20] sm:$0xff] %v1234_v57 }
 0x1e6   : > { %1243 = vst [vmem:[%s352_s23 + $0x28] sm:$0xff] %v1235_v59 }
 0x1e7 PF: > { %s17_s26 = sadd.s32 1, %s1556_s26   ;;  %s2336_s24 = smov %s1552_s25 }
 0x1e8   : > { %p14_p5 = scmp.ge.s32.totalorder %s17_s26, 4   ;;  %s2337_s25 = smov %s2339_s27 }
 0x1ea   :  { %16 = sbr.rel (!%p14_p5) target bundleno = 2 (0x2), region = 81 }

</bundles_post_ra>
